<compile_context>
chip_gen: v7x
topology: tpu7x:2x2x1
jax: 0.10.0
libtpu: 0.0.40
codegen_flags: <defaults>
</compile_context>

<pallas_src>
import jax
import jax.numpy as jnp
from jax.experimental import pallas as pl
from jax.experimental.pallas import tpu as pltpu

_EPS = 1e-12
_MIB = 1024 * 1024
_VMEM_BUDGET = 48 * _MIB  # v7x-safe working set (64 MiB/TC); v5e/v6e have more.


def _round_up(x: int, m: int) -> int:
    return (x + m - 1) // m * m


def _lp_kernel(x_ref, p_ref, o_ref):
    # x_ref: (TN, D_pad)  features tile (native dtype)
    # p_ref: (TC, D_pad)  prototypes, already L2-normalized * exp(logit_scale), bf16
    # o_ref: (TN, TC)     logits tile
    x = x_ref[...].astype(jnp.float32)
    inv_nx = jax.lax.rsqrt(jnp.sum(x * x, axis=-1, keepdims=True) + _EPS)  # EUP

    d_blk = x_ref.shape[-1]
    c_blk = o_ref.shape[-1]
    dn = (((1,), (1,)), ((), ()))  # contract D <-> D; RHS stays in native (C, D)

    if c_blk > d_blk:
        # Pre-scale: VPU work is TN*D instead of TN*C.
        xb = (x * inv_nx).astype(jnp.bfloat16)
        s = jax.lax.dot_general(xb, p_ref[...], dn,
                                preferred_element_type=jnp.float32)
        o_ref[...] = s.astype(o_ref.dtype)
    else:
        xb = x.astype(jnp.bfloat16)
        s = jax.lax.dot_general(xb, p_ref[...], dn,
                                preferred_element_type=jnp.float32)
        o_ref[...] = (s * inv_nx).astype(o_ref.dtype)


def adapter_forward(features, prototypes, logit_scale, out_dtype=jnp.float32):
    """features: [N, D], prototypes: [C, D], logit_scale: python / 0-d scalar."""
    n, d = features.shape
    c, d2 = prototypes.shape
    assert d == d2

    d_pad = _round_up(d, 128)
    c_pad = _round_up(c, 128)

    # --- wrapper-side preprocessing (cheap: C*D + scalar work) ---------------
    scale = jnp.exp(jnp.asarray(logit_scale, jnp.float32))
    p32 = prototypes.astype(jnp.float32)
    inv_np = jax.lax.rsqrt(jnp.sum(p32 * p32, axis=-1, keepdims=True) + _EPS)
    p_prep = (p32 * (inv_np * scale)).astype(jnp.bfloat16)
    if c_pad != c or d_pad != d:
        p_prep = jnp.pad(p_prep, ((0, c_pad - c), (0, d_pad - d)))

    # Features: untouched when D is already lane-aligned; pad D only otherwise.
    x_in = features if d_pad == d else jnp.pad(features, ((0, 0), (0, d_pad - d)))
    in_bytes = x_in.dtype.itemsize
    out_bytes = jnp.dtype(out_dtype).itemsize

    n8 = _round_up(n, 8)

    # --- tile selection against a v7x-safe VMEM budget -----------------------
    proto_resident_bytes = c_pad * d_pad * 2  # bf16, single buffer
    if proto_resident_bytes <= _VMEM_BUDGET // 2:
        tc = c_pad
        proto_bytes = proto_resident_bytes
    else:
        # Large zero-shot heads: stream prototypes in (TC, D_pad) tiles.
        tc = 128
        for cand in (4096, 2048, 1024, 512, 256):
            if c_pad % cand == 0 and 2 * cand * d_pad * 2 <= _VMEM_BUDGET // 2:
                tc = cand
                break
        proto_bytes = 2 * tc * d_pad * 2  # double-buffered bf16 tiles

    per_row = 2 * d_pad * in_bytes + 2 * tc * out_bytes  # double-buffered x + out
    tn = (_VMEM_BUDGET - proto_bytes) // per_row
    tn = max(8, min(512, n8, (tn // 8) * 8))

    grid_n = pl.cdiv(n, tn)
    vmem_used = proto_bytes + tn * per_row
    vmem_limit = int(min(64 * _MIB, max(32 * _MIB, vmem_used + 8 * _MIB)))

    cost = pl.CostEstimate(
        flops=2 * n * d_pad * c_pad,
        transcendentals=n,
        bytes_accessed=n * d_pad * in_bytes + c_pad * d_pad * 2
        + n * c_pad * out_bytes,
    )

    def build(single_buffer_protos):
        if tc == c_pad:
            proto_kwargs = (
                dict(pipeline_mode=pl.Buffered(1)) if single_buffer_protos else {}
            )
            grid = (grid_n,)
            in_specs = [
                pl.BlockSpec((tn, d_pad), lambda i: (i, 0)),
                pl.BlockSpec((c_pad, d_pad), lambda i: (0, 0), **proto_kwargs),
            ]
            out_specs = pl.BlockSpec((tn, c_pad), lambda i: (i, 0))
            dims = ("parallel",)
        else:
            grid = (grid_n, c_pad // tc)
            in_specs = [
                pl.BlockSpec((tn, d_pad), lambda i, j: (i, 0)),
                pl.BlockSpec((tc, d_pad), lambda i, j: (j, 0)),
            ]
            out_specs = pl.BlockSpec((tn, tc), lambda i, j: (i, j))
            dims = ("parallel", "parallel")
        return pl.pallas_call(
            _lp_kernel,
            out_shape=jax.ShapeDtypeStruct((n, c_pad), out_dtype),
            grid=grid,
            in_specs=in_specs,
            out_specs=out_specs,
            compiler_params=pltpu.CompilerParams(
                dimension_semantics=dims,
                vmem_limit_bytes=vmem_limit,
            ),
            cost_estimate=cost,
        )

    try:
        out_pad = build(single_buffer_protos=True)(x_in, p_prep)
    except Exception:
        # Fallback if this JAX build rejects pl.Buffered(1) on the resident operand.
        out_pad = build(single_buffer_protos=False)(x_in, p_prep)

    return out_pad[:, :c]


def _reference(features, prototypes, logit_scale):
    fn = features / jnp.linalg.norm(features, axis=-1, keepdims=True)
    pn = prototypes / jnp.linalg.norm(prototypes, axis=-1, keepdims=True)
    return fn @ pn.T * jnp.exp(jnp.asarray(logit_scale, jnp.float32))


if __name__ == "__main__":
    key = jax.random.PRNGKey(0)
    k_feat, k_proto = jax.random.split(key)

    # Small shapes consistent with the module: N image features of dim D,
    # C class prototypes of dim D.
    N, C, D = 8, 4, 32
    features = jax.random.normal(k_feat, (N, D), dtype=jnp.float32)

    # Deterministic "zero-shot" prototypes (Adapter default: adapter='ZS' =>
    # init='zero_shot' => prototypes = initial_prototypes clone).
    initial_prototypes = jax.random.normal(k_proto, (C, D), dtype=jnp.float32)

    # CLIP-style logit scale: log(1/0.07)
    logit_scale = float(jnp.log(1.0 / 0.07))

    out = adapter_forward(features, initial_prototypes, logit_scale)
    out = jax.block_until_ready(out)

    ref = _reference(features, initial_prototypes, logit_scale)
    assert out.shape == (N, C)
    # bf16 MXU operands (f32 accumulation) => relax tolerance vs the pure-f32
    # reference; logits are bounded by exp(logit_scale) ~= 14.3.
    assert jnp.allclose(out, ref, atol=1.5e-1, rtol=2e-2), "mismatch vs reference"

    print("KERNEL_OK")
</pallas_src>

<mosaic_0001>
module attributes {stable_mosaic.version = 11 : i64} {
  func.func @_lp_kernel(%arg0: i32, %arg1: memref<8x128xf32, #tpu.memory_space<vmem>>, %arg2: memref<128x128xbf16, #tpu.memory_space<vmem>>, %arg3: memref<8x128xf32, #tpu.memory_space<vmem>>) attributes {dimension_semantics = [#tpu.dimension_semantics<parallel>], iteration_bounds = array<i64: 1>, scalar_prefetch = 0 : i64, scratch_operands = 0 : i64, tpu.core_type = #tpu.core_type<tc>, window_params = [{transform_indices = @transform_0, window_bounds = array<i64: 8, 128>}, {pipeline_mode = #tpu.pipeline_mode<synchronous>, transform_indices = @transform_1, window_bounds = array<i64: 128, 128>}, {transform_indices = @transform_2, window_bounds = array<i64: 8, 128>}]} {
    %c0 = arith.constant 0 : index
    %c0_0 = arith.constant 0 : index
    %0 = vector.load %arg1[%c0, %c0_0] : memref<8x128xf32, #tpu.memory_space<vmem>>, vector<8x128xf32>
    %1 = arith.mulf %0, %0 : vector<8x128xf32>
    %cst = arith.constant dense<0.000000e+00> : vector<8xf32>
    %2 = vector.multi_reduction <add>, %1, %cst [1] : vector<8x128xf32> to vector<8xf32>
    %3 = vector.shape_cast %2 : vector<8xf32> to vector<8x1xf32>
    %cst_1 = arith.constant 9.99999996E-13 : f32
    %4 = vector.broadcast %cst_1 : f32 to vector<8x1xf32>
    %5 = arith.addf %3, %4 : vector<8x1xf32>
    %6 = math.rsqrt %5 : vector<8x1xf32>
    %7 = arith.truncf %0 : vector<8x128xf32> to vector<8x128xbf16>
    %c0_2 = arith.constant 0 : index
    %c0_3 = arith.constant 0 : index
    %8 = vector.load %arg2[%c0_2, %c0_3] : memref<128x128xbf16, #tpu.memory_space<vmem>>, vector<128x128xbf16>
    %cst_4 = arith.constant dense<0.000000e+00> : vector<8x128xf32>
    %9 = tpu.matmul %7, %8, %cst_4 {dimension_numbers = #tpu.dot_dimension_numbers<[1], [1], [0], [0], [0, 0, 1, 0], [], []>} : vector<8x128xbf16>, vector<128x128xbf16>, vector<8x128xf32> -> vector<8x128xf32>
    %10 = vector.broadcast %6 : vector<8x1xf32> to vector<8x128xf32>
    %11 = arith.mulf %9, %10 : vector<8x128xf32>
    %c0_5 = arith.constant 0 : index
    %c0_6 = arith.constant 0 : index
    %12 = vector.load %arg3[%c0_5, %c0_6] : memref<8x128xf32, #tpu.memory_space<vmem>>, vector<8x128xf32>
    tpu.vector_store %arg3[%c0_5, %c0_6], %11 {strides = array<i32>} : memref<8x128xf32, #tpu.memory_space<vmem>>, vector<8x128xf32>,
    return
  }
  func.func @transform_0(%arg0: i32) -> (i32, i32) {
    %c0_i32 = arith.constant 0 : i32
    %c0_i32_0 = arith.constant 0 : i32
    return %arg0, %c0_i32 : i32, i32
  }
  func.func @transform_1(%arg0: i32) -> (i32, i32) {
    %c0_i32 = arith.constant 0 : i32
    %c0_i32_0 = arith.constant 0 : i32
    %c0_i32_1 = arith.constant 0 : i32
    return %c0_i32, %c0_i32_0 : i32, i32
  }
  func.func @transform_2(%arg0: i32) -> (i32, i32) {
    %c0_i32 = arith.constant 0 : i32
    %c0_i32_0 = arith.constant 0 : i32
    return %arg0, %c0_i32 : i32, i32
  }
}

module attributes {stable_mosaic.version = 11 : i64} {
  func.func @_lp_kernel(%arg0: i32, %arg1: memref<8x128xf32, #tpu.memory_space<vmem>>, %arg2: memref<128x128xbf16, #tpu.memory_space<vmem>>, %arg3: memref<8x128xf32, #tpu.memory_space<vmem>>) attributes {dimension_semantics = [#tpu.dimension_semantics<parallel>], iteration_bounds = array<i64: 1>, scalar_prefetch = 0 : i64, scratch_operands = 0 : i64, tpu.core_type = #tpu.core_type<tc>, window_params = [{transform_indices = @transform_0, window_bounds = array<i64: 8, 128>}, {pipeline_mode = #tpu.pipeline_mode<synchronous>, transform_indices = @transform_1, window_bounds = array<i64: 128, 128>}, {transform_indices = @transform_2, window_bounds = array<i64: 8, 128>}]} {
    %c0 = arith.constant 0 : index
    %c0_0 = arith.constant 0 : index
    %0 = vector.load %arg1[%c0, %c0_0] : memref<8x128xf32, #tpu.memory_space<vmem>>, vector<8x128xf32>
    %1 = arith.mulf %0, %0 : vector<8x128xf32>
    %cst = arith.constant dense<0.000000e+00> : vector<8xf32>
    %2 = vector.multi_reduction <add>, %1, %cst [1] : vector<8x128xf32> to vector<8xf32>
    %3 = vector.shape_cast %2 : vector<8xf32> to vector<8x1xf32>
    %cst_1 = arith.constant 9.99999996E-13 : f32
    %4 = vector.broadcast %cst_1 : f32 to vector<8x1xf32>
    %5 = arith.addf %3, %4 : vector<8x1xf32>
    %6 = math.rsqrt %5 : vector<8x1xf32>
    %7 = arith.truncf %0 : vector<8x128xf32> to vector<8x128xbf16>
    %c0_2 = arith.constant 0 : index
    %c0_3 = arith.constant 0 : index
    %8 = vector.load %arg2[%c0_2, %c0_3] : memref<128x128xbf16, #tpu.memory_space<vmem>>, vector<128x128xbf16>
    %cst_4 = arith.constant dense<0.000000e+00> : vector<8x128xf32>
    %9 = tpu.matmul %7, %8, %cst_4 {dimension_numbers = #tpu.dot_dimension_numbers<[1], [1], [0], [0], [0, 0, 1, 0], [], []>} : vector<8x128xbf16>, vector<128x128xbf16>, vector<8x128xf32> -> vector<8x128xf32>
    %10 = vector.broadcast %6 : vector<8x1xf32> to vector<8x128xf32>
    %11 = arith.mulf %9, %10 : vector<8x128xf32>
    %c0_5 = arith.constant 0 : index
    %c0_6 = arith.constant 0 : index
    %12 = vector.load %arg3[%c0_5, %c0_6] : memref<8x128xf32, #tpu.memory_space<vmem>>, vector<8x128xf32>
    tpu.vector_store %arg3[%c0_5, %c0_6], %11 {strides = array<i32>} : memref<8x128xf32, #tpu.memory_space<vmem>>, vector<8x128xf32>,
    return
  }
  func.func @transform_0(%arg0: i32) -> (i32, i32) {
    %c0_i32 = arith.constant 0 : i32
    %c0_i32_0 = arith.constant 0 : i32
    return %arg0, %c0_i32 : i32, i32
  }
  func.func @transform_1(%arg0: i32) -> (i32, i32) {
    %c0_i32 = arith.constant 0 : i32
    %c0_i32_0 = arith.constant 0 : i32
    %c0_i32_1 = arith.constant 0 : i32
    return %c0_i32, %c0_i32_0 : i32, i32
  }
  func.func @transform_2(%arg0: i32) -> (i32, i32) {
    %c0_i32 = arith.constant 0 : i32
    %c0_i32_0 = arith.constant 0 : i32
    return %arg0, %c0_i32 : i32, i32
  }
}

</mosaic_0001>

<bundles_post_ra>
// kernel: tpu_custom_call.1
= control target key start
LH: loop header
LB: loop body
LE: loop exit
PB: predicated region body
PF: predicated region fallthrough
CT: control target
= control target key end

     0   :  { %7 = vsyncpa [#allocation3], 0  ;;  %s359_s0 = inlined_call_operand.hbm [shape: f32[8,128], index: 0, kind: input, shape index: {}]   ;;  %s360_s1 = inlined_call_operand.hbm [shape: bf16[128,128], index: 1, kind: input, shape index: {}]   ;;  %s361_s2 = inlined_call_operand.hbm [shape: f32[8,128], index: 2, kind: output, shape index: {}]  }
   0x1   :  { %8 = vsyncpa [#allocation6], 0 }
   0x2   :  { %9 = vsyncpa [#allocation4], 0  ;;  %s294_s9 = smov [#allocation2]   ;;  %s295_s11 = smov [#allocation5]  }
   0x3   :  { %s16_s10 = sshll.u32 %s294_s9, 4  ;;  %s25_s12 = sshll.u32 %s295_s11, 4  ;;  %s17_s10 = int_to_ptr.vmem [resolvable:$true] %s16_s10  ;;  %s316_s12 = int_to_ptr.vmem [resolvable:$true] %s25_s12 }
   0x4   :  { %s222_s15 = scalar_lea.hbm %s359_s0, 128 }
   0x5   :  { %p223_p0 = scmp.ne.s32.totalorder %s359_s0, %s222_s15  ;;  %p226_p1 = scmp.lt.u32.totalorder %s222_s15, %s359_s0 }
   0x7   :  { %p228_p2 = pnand %p226_p1, %p223_p0 }
   0x9   :  { %231 = shalt.err (!%p228_p2)
}
   0xa   :  { %s232_s20 = scalar_lea.vmem %s17_s10, 128  ;;  %p237_p4 = scmp.lt.s32.totalorder %s17_s10, %s17_s10 }
   0xb   :  { %p233_p3 = scmp.ne.s32.totalorder %s17_s10, %s232_s20  ;;  %p238_p5 = scmp.lt.s32.totalorder %s232_s20, %s232_s20 }
   0xd   :  { %p239_p6 = por %p238_p5, %p237_p4 }
   0xf   :  { %p240_p7 = pnand %p239_p6, %p233_p3 }
  0x11   :  { %243 = shalt.err (!%p240_p7)
}
  0x12   :  { %19 = dma.hbm_to_vmem [thread:$0]  %s359_s0, 128, %s17_s10, [#allocation3]  }
  0x13   :  { %s244_s25 = scalar_lea.hbm %s360_s1, 1024 }
  0x14   :  { %p245_p8 = scmp.ne.s32.totalorder %s360_s1, %s244_s25  ;;  %p248_p9 = scmp.lt.u32.totalorder %s244_s25, %s360_s1 }
  0x16   :  { %p250_p10 = pnand %p248_p9, %p245_p8 }
  0x18   :  { %253 = shalt.err (!%p250_p10)
}
  0x19   :  { %s254_s30 = scalar_lea.vmem %s316_s12, 1024  ;;  %p259_p12 = scmp.lt.s32.totalorder %s316_s12, %s316_s12 }
  0x1a   :  { %p255_p11 = scmp.ne.s32.totalorder %s316_s12, %s254_s30  ;;  %p260_p13 = scmp.lt.s32.totalorder %s254_s30, %s254_s30 }
  0x1c   :  { %p261_p0 = por %p260_p13, %p259_p12 }
  0x1e   :  { %p262_p1 = pnand %p261_p0, %p255_p11 }
  0x20   :  { %265 = shalt.err (!%p262_p1)
}
  0x21   :  { %s296_s0 = smov 64   ;;  %s297_s3 = smov 4  }
  0x22   :  { %31 = dma.hbm_to_vmem [thread:$0]  %s360_s1, 1024, %s316_s12, [#allocation6], %s296_s0, %s296_s0, %s297_s3  }
  0x23   :  { %288 = dma.done.wait [#allocation3], 128  }
  0x24   :  { %289 = vsyncadd [#allocation3], 4294967168 }
  0x25   :  { %290 = dma.done.wait [#allocation6], 1024  }
  0x26   :  { %291 = vsyncadd [#allocation6], 4294966272  ;;  %v298_v0 = vmov 0.0   ;;  %vm299_vm0 = vmmov 0   ;;  %v212_v1 = vld [vmem:[#allocation5] sm:$0xff]   ;;  %v213_v2 = vld [vmem:[#allocation5 + $0x8] sm:$0xff]  }
  0x27   :  { %185 = vmatprep.subr.bf16.mxu0 %v298_v0  ;;  %201 = vmatprep.mubr.msk.bf16.mxu0 %vm299_vm0, %v298_v0  ;;  %v39_v3 = vld [vmem:[#allocation2] sm:$0xff]  ;;  %v214_v5 = vld [vmem:[#allocation5 + $0x10] sm:$0xff]   ;;  %v216_v7 = vld [vmem:[#allocation5 + $0x20] sm:$0xff]   ;;  %s300_s1 = smov [#allocation7]  }
  0x28   :  { %186 = vmatpush3.bf16.xpose.msra.mxu0 %v212_v1  ;;  %v40_v4 = vmul.f32 %v39_v3, %v39_v3  ;;  %v215_v6 = vld [vmem:[#allocation5 + $0x18] sm:$0xff]   ;;  %v217_v8 = vld [vmem:[#allocation5 + $0x28] sm:$0xff]   ;;  %v218_v9 = vld [vmem:[#allocation5 + $0x30] sm:$0xff]   ;;  %v45_v11 = vpack.c.bf16 %v39_v3, %v39_v3  ;;  %s158_s6 = sshll.u32 %s300_s1, 4  ;;  %s159_s6 = int_to_ptr.vmem [resolvable:$true] %s158_s6 }
  0x29   :  { %187 = vmatprep.subr.bf16.mxu0 %v298_v0  ;;  %v219_v10 = vld [vmem:[#allocation5 + $0x38] sm:$0xff]   ;;  %s266_s7 = scalar_lea.vmem %s159_s6, 128  ;;  %p271_p3 = scmp.lt.s32.totalorder %s159_s6, %s159_s6 }
  0x2a   :  { %41 = vadd.xlane.f32.xlu0 %v40_v4  ;;  %p267_p2 = scmp.ne.s32.totalorder %s159_s6, %s266_s7  ;;  %p272_p4 = scmp.lt.s32.totalorder %s266_s7, %s266_s7 }
  0x2c   :  { %p273_p5 = por %p272_p4, %p271_p3 }
  0x2e   :  { %p274_p6 = pnand %p273_p5, %p267_p2 }
  0x30   :  { %188 = vmatpush3.bf16.xpose.msra.mxu0 %v213_v2 }
  0x31   :  { %189 = vmatprep.subr.bf16.mxu0 %v298_v0 }
  0x38   :  { %190 = vmatpush3.bf16.xpose.msra.mxu0 %v214_v5 }
  0x39   :  { %191 = vmatprep.subr.bf16.mxu0 %v298_v0 }
  0x40   :  { %192 = vmatpush3.bf16.xpose.msra.mxu0 %v215_v6 }
  0x41   :  { %193 = vmatprep.subr.bf16.mxu0 %v298_v0 }
  0x48   :  { %194 = vmatpush3.bf16.xpose.msra.mxu0 %v216_v7 }
  0x49   :  { %195 = vmatprep.subr.bf16.mxu0 %v298_v0 }
  0x50   :  { %196 = vmatpush3.bf16.xpose.msra.mxu0 %v217_v8 }
  0x51   :  { %197 = vmatprep.subr.bf16.mxu0 %v298_v0 }
  0x58   :  { %198 = vmatpush3.bf16.xpose.msra.mxu0 %v218_v9 }
  0x59   :  { %199 = vmatprep.subr.bf16.mxu0 %v298_v0 }
  0x60   :  { %200 = vmatpush3.bf16.xpose.msra.mxu0 %v219_v10 }
  0x67   :  { %202 = vmatmul.mubr.bf16.vlgmr.msra.gmra.mrb[0].mxu0 %v45_v11 }
  0xb7   :  { %v42_v12 = vpop.xlane.xlu0 %41 }
  0xb8   :  { %v43_v13 = vadd.f32 1e-12, %v42_v12 }
  0xba   :  { %220 = vrsqrt.f32 %v43_v13 }
  0xc4   :  { %v221_v14 = vpop.eup %220 }
 0x13a   :  { %v144_v15 = vpop.f32.mrb[0].mxu0 }
 0x13b   :  { %v150_v16 = vmul.f32 %v221_v14, %v144_v15  ;;  %v203_v17 = vpop.f32.mrb[1].mxu0 }
 0x13c   :  { %v147_v18 = vpop.f32.mrb[2].mxu0 }
 0x13d   :  { %151 = vst [vmem:[#allocation7] sm:$0xff] %v150_v16  ;;  %v204_v19 = vpop.f32.mrb[3].mxu0 }
 0x13e   :  { %277 = shalt.err (!%p274_p6)
}
 0x13f   :  { %s278_s10 = scalar_lea.hbm %s361_s2, 128 }
 0x140   :  { %p279_p7 = scmp.ne.s32.totalorder %s361_s2, %s278_s10  ;;  %p282_p8 = scmp.lt.u32.totalorder %s278_s10, %s361_s2 }
 0x142   :  { %p284_p9 = pnand %p282_p8, %p279_p7 }
 0x144   :  { %287 = shalt.err (!%p284_p9)
}
 0x145   :  { %161 = dma.vmem_to_hbm [thread:$0]  %s159_s6, 128, %s361_s2, [#allocation4]  }
 0x146   :  { %292 = dma.done.wait [#allocation4], 128  }
 0x147   :  { %293 = vsyncadd [#allocation4], 4294967168 }
 0x148   :  { %165 = vsyncpa [#allocation3], 1 }
 0x149   :  { %166 = vsyncpa [#allocation6], 1 }
 0x14a   :  { %167 = vsyncpa [#allocation4], 1 }

// kernel: tpu_custom_call.1
= control target key start
LH: loop header
LB: loop body
LE: loop exit
PB: predicated region body
PF: predicated region fallthrough
CT: control target
= control target key end

     0   :  { %7 = vsyncpa [#allocation3], 0  ;;  %s359_s0 = inlined_call_operand.hbm [shape: f32[8,128], index: 0, kind: input, shape index: {}]   ;;  %s360_s1 = inlined_call_operand.hbm [shape: bf16[128,128], index: 1, kind: input, shape index: {}]   ;;  %s361_s2 = inlined_call_operand.hbm [shape: f32[8,128], index: 2, kind: output, shape index: {}]  }
   0x1   :  { %8 = vsyncpa [#allocation6], 0 }
   0x2   :  { %9 = vsyncpa [#allocation4], 0  ;;  %s294_s9 = smov [#allocation2]   ;;  %s295_s11 = smov [#allocation5]  }
   0x3   :  { %s16_s10 = sshll.u32 %s294_s9, 4  ;;  %s25_s12 = sshll.u32 %s295_s11, 4  ;;  %s17_s10 = int_to_ptr.vmem [resolvable:$true] %s16_s10  ;;  %s316_s12 = int_to_ptr.vmem [resolvable:$true] %s25_s12 }
   0x4   :  { %s222_s15 = scalar_lea.hbm %s359_s0, 128 }
   0x5   :  { %p223_p0 = scmp.ne.s32.totalorder %s359_s0, %s222_s15  ;;  %p226_p1 = scmp.lt.u32.totalorder %s222_s15, %s359_s0 }
   0x7   :  { %p228_p2 = pnand %p226_p1, %p223_p0 }
   0x9   :  { %231 = shalt.err (!%p228_p2)
}
   0xa   :  { %s232_s20 = scalar_lea.vmem %s17_s10, 128  ;;  %p237_p4 = scmp.lt.s32.totalorder %s17_s10, %s17_s10 }
   0xb   :  { %p233_p3 = scmp.ne.s32.totalorder %s17_s10, %s232_s20  ;;  %p238_p5 = scmp.lt.s32.totalorder %s232_s20, %s232_s20 }
   0xd   :  { %p239_p6 = por %p238_p5, %p237_p4 }
   0xf   :  { %p240_p7 = pnand %p239_p6, %p233_p3 }
  0x11   :  { %243 = shalt.err (!%p240_p7)
}
  0x12   :  { %19 = dma.hbm_to_vmem [thread:$0]  %s359_s0, 128, %s17_s10, [#allocation3]  }
  0x13   :  { %s244_s25 = scalar_lea.hbm %s360_s1, 1024 }
  0x14   :  { %p245_p8 = scmp.ne.s32.totalorder %s360_s1, %s244_s25  ;;  %p248_p9 = scmp.lt.u32.totalorder %s244_s25, %s360_s1 }
  0x16   :  { %p250_p10 = pnand %p248_p9, %p245_p8 }
  0x18   :  { %253 = shalt.err (!%p250_p10)
}
  0x19   :  { %s254_s30 = scalar_lea.vmem %s316_s12, 1024  ;;  %p259_p12 = scmp.lt.s32.totalorder %s316_s12, %s316_s12 }
  0x1a   :  { %p255_p11 = scmp.ne.s32.totalorder %s316_s12, %s254_s30  ;;  %p260_p13 = scmp.lt.s32.totalorder %s254_s30, %s254_s30 }
  0x1c   :  { %p261_p0 = por %p260_p13, %p259_p12 }
  0x1e   :  { %p262_p1 = pnand %p261_p0, %p255_p11 }
  0x20   :  { %265 = shalt.err (!%p262_p1)
}
  0x21   :  { %s296_s0 = smov 64   ;;  %s297_s3 = smov 4  }
  0x22   :  { %31 = dma.hbm_to_vmem [thread:$0]  %s360_s1, 1024, %s316_s12, [#allocation6], %s296_s0, %s296_s0, %s297_s3  }
  0x23   :  { %288 = dma.done.wait [#allocation3], 128  }
  0x24   :  { %289 = vsyncadd [#allocation3], 4294967168 }
  0x25   :  { %290 = dma.done.wait [#allocation6], 1024  }
  0x26   :  { %291 = vsyncadd [#allocation6], 4294966272  ;;  %v298_v0 = vmov 0.0   ;;  %vm299_vm0 = vmmov 0   ;;  %v212_v1 = vld [vmem:[#allocation5] sm:$0xff]   ;;  %v213_v2 = vld [vmem:[#allocation5 + $0x8] sm:$0xff]  }
  0x27   :  { %185 = vmatprep.subr.bf16.mxu0 %v298_v0  ;;  %201 = vmatprep.mubr.msk.bf16.mxu0 %vm299_vm0, %v298_v0  ;;  %v39_v3 = vld [vmem:[#allocation2] sm:$0xff]  ;;  %v214_v5 = vld [vmem:[#allocation5 + $0x10] sm:$0xff]   ;;  %v216_v7 = vld [vmem:[#allocation5 + $0x20] sm:$0xff]   ;;  %s300_s1 = smov [#allocation7]  }
  0x28   :  { %186 = vmatpush3.bf16.xpose.msra.mxu0 %v212_v1  ;;  %v40_v4 = vmul.f32 %v39_v3, %v39_v3  ;;  %v215_v6 = vld [vmem:[#allocation5 + $0x18] sm:$0xff]   ;;  %v217_v8 = vld [vmem:[#allocation5 + $0x28] sm:$0xff]   ;;  %v218_v9 = vld [vmem:[#allocation5 + $0x30] sm:$0xff]   ;;  %v45_v11 = vpack.c.bf16 %v39_v3, %v39_v3  ;;  %s158_s6 = sshll.u32 %s300_s1, 4  ;;  %s159_s6 = int_to_ptr.vmem [resolvable:$true] %s158_s6 }
  0x29   :  { %187 = vmatprep.subr.bf16.mxu0 %v298_v0  ;;  %v219_v10 = vld [vmem:[#allocation5 + $0x38] sm:$0xff]   ;;  %s266_s7 = scalar_lea.vmem %s159_s6, 128  ;;  %p271_p3 = scmp.lt.s32.totalorder %s159_s6, %s159_s6 }
  0x2a   :  { %41 = vadd.xlane.f32.xlu0 %v40_v4  ;;  %p267_p2 = scmp.ne.s32.totalorder %s159_s6, %s266_s7  ;;  %p272_p4 = scmp.lt.s32.totalorder %s266_s7, %s266_s7 }
  0x2c   :  { %p273_p5 = por %p272_p4, %p271_p3 }
  0x2e   :  { %p274_p6 = pnand %p273_p5, %p267_p2 }
  0x30   :  { %188 = vmatpush3.bf16.xpose.msra.mxu0 %v213_v2 }
  0x31   :  { %189 = vmatprep.subr.bf16.mxu0 %v298_v0 }
  0x38   :  { %190 = vmatpush3.bf16.xpose.msra.mxu0 %v214_v5 }
  0x39   :  { %191 = vmatprep.subr.bf16.mxu0 %v298_v0 }
  0x40   :  { %192 = vmatpush3.bf16.xpose.msra.mxu0 %v215_v6 }
  0x41   :  { %193 = vmatprep.subr.bf16.mxu0 %v298_v0 }
  0x48   :  { %194 = vmatpush3.bf16.xpose.msra.mxu0 %v216_v7 }
  0x49   :  { %195 = vmatprep.subr.bf16.mxu0 %v298_v0 }
  0x50   :  { %196 = vmatpush3.bf16.xpose.msra.mxu0 %v217_v8 }
  0x51   :  { %197 = vmatprep.subr.bf16.mxu0 %v298_v0 }
  0x58   :  { %198 = vmatpush3.bf16.xpose.msra.mxu0 %v218_v9 }
  0x59   :  { %199 = vmatprep.subr.bf16.mxu0 %v298_v0 }
  0x60   :  { %200 = vmatpush3.bf16.xpose.msra.mxu0 %v219_v10 }
  0x67   :  { %202 = vmatmul.mubr.bf16.vlgmr.msra.gmra.mrb[0].mxu0 %v45_v11 }
  0xb7   :  { %v42_v12 = vpop.xlane.xlu0 %41 }
  0xb8   :  { %v43_v13 = vadd.f32 1e-12, %v42_v12 }
  0xba   :  { %220 = vrsqrt.f32 %v43_v13 }
  0xc4   :  { %v221_v14 = vpop.eup %220 }
 0x13a   :  { %v144_v15 = vpop.f32.mrb[0].mxu0 }
 0x13b   :  { %v150_v16 = vmul.f32 %v221_v14, %v144_v15  ;;  %v203_v17 = vpop.f32.mrb[1].mxu0 }
 0x13c   :  { %v147_v18 = vpop.f32.mrb[2].mxu0 }
 0x13d   :  { %151 = vst [vmem:[#allocation7] sm:$0xff] %v150_v16  ;;  %v204_v19 = vpop.f32.mrb[3].mxu0 }
 0x13e   :  { %277 = shalt.err (!%p274_p6)
}
 0x13f   :  { %s278_s10 = scalar_lea.hbm %s361_s2, 128 }
 0x140   :  { %p279_p7 = scmp.ne.s32.totalorder %s361_s2, %s278_s10  ;;  %p282_p8 = scmp.lt.u32.totalorder %s278_s10, %s361_s2 }
 0x142   :  { %p284_p9 = pnand %p282_p8, %p279_p7 }
 0x144   :  { %287 = shalt.err (!%p284_p9)
}
 0x145   :  { %161 = dma.vmem_to_hbm [thread:$0]  %s159_s6, 128, %s361_s2, [#allocation4]  }
 0x146   :  { %292 = dma.done.wait [#allocation4], 128  }
 0x147   :  { %293 = vsyncadd [#allocation4], 4294967168 }
 0x148   :  { %165 = vsyncpa [#allocation3], 1 }
 0x149   :  { %166 = vsyncpa [#allocation6], 1 }
 0x14a   :  { %167 = vsyncpa [#allocation4], 1 }

</bundles_post_ra>
